<compile_context>
chip_gen: v6e
topology: v6e:2x2x1
jax: 0.10.0
libtpu: 0.0.40
codegen_flags: <defaults>
</compile_context>

<pallas_src>
import jax
import jax.numpy as jnp
from jax.experimental import pallas as pl
from jax.experimental.pallas import tpu as pltpu

EPS = 1e-8


def _pixelnorm_kernel(x_ref, o_ref):
    # x_ref / o_ref: (TM, C) VMEM tile of rows; each row is one token.
    x = x_ref[...].astype(jnp.float32)
    # mean of squares over the channel (last / lane) axis -> XLU reduce
    ms = jnp.mean(x * x, axis=-1, keepdims=True)
    # rsqrt -> EUP; multiply -> VPU. All hidden under the HBM DMA.
    o_ref[...] = (x * jax.lax.rsqrt(ms + EPS)).astype(o_ref.dtype)


def pixel_norm(x, *, tile_in_bytes=2 << 20, vmem_tile_budget_bytes=16 << 20):
    """x: (B, N, C). Returns x * rsqrt(mean(x^2, axis=2, keepdims=True) + 1e-8)."""
    B, N, C = x.shape
    R = B * N
    x2 = x.reshape(R, C)

    itemsize = jnp.dtype(x.dtype).itemsize
    # Sublane multiple for the dtype: 8 (f32), 16 (bf16), 32 (int8/fp8).
    sub = max(8, 32 // itemsize)

    # --- Tile sizing by bytes: ~2 MiB of input per block. ---
    tm_target = max(sub, (tile_in_bytes // (C * itemsize)) // sub * sub)

    # VMEM clip: double-buffered input + output (4 * C * itemsize per row)
    # plus ~3 f32 temporaries (x, x*x, result) materialized in the kernel.
    per_row_bytes = C * (4 * itemsize + 12)
    tm_max = max(sub, (vmem_tile_budget_bytes // per_row_bytes) // sub * sub)

    tm = min(tm_target, tm_max)

    # Keep >= 4 grid tiles when R allows (feeds both v7x TensorCores; harmless
    # on single-TC v5e/v6e since tiles stay >= the byte target for large R).
    tm_quarter = (R // 4) // sub * sub
    if tm_quarter >= sub:
        tm = min(tm, tm_quarter)

    if tm >= R:
        # Single full-extent block (block row dim == array dim is always legal).
        tm = R
    else:
        tm = max(sub, (tm // sub) * sub)

    num_tiles = pl.cdiv(R, tm)

    out = pl.pallas_call(
        _pixelnorm_kernel,
        out_shape=jax.ShapeDtypeStruct((R, C), x.dtype),
        grid_spec=pltpu.PrefetchScalarGridSpec(
            num_scalar_prefetch=0,
            grid=(num_tiles,),
            in_specs=[pl.BlockSpec((tm, C), lambda i: (i, 0))],
            out_specs=pl.BlockSpec((tm, C), lambda i: (i, 0)),
        ),
        compiler_params=pltpu.CompilerParams(
            dimension_semantics=("parallel",),
            vmem_limit_bytes=32 * 1024 * 1024,
        ),
    )(x2)

    return out.reshape(B, N, C)


def pixel_norm_ref(x):
    """Pure-JAX reference matching the PyTorch forward exactly."""
    xf = x.astype(jnp.float32)
    ms = jnp.mean(xf * xf, axis=2, keepdims=True)
    return (xf * jax.lax.rsqrt(ms + EPS)).astype(x.dtype)


if __name__ == "__main__":
    key = jax.random.PRNGKey(0)
    k0, k1, k2 = jax.random.split(key, 3)

    # Lane-dense case (C a multiple of 128 — the deployed TransGAN regime).
    # R = 128 -> the >=4-tiles cap kicks in (4 tiles of 32 rows).
    B, N, C = 2, 64, 128
    x = jax.random.normal(k0, (B, N, C), dtype=jnp.float32)
    y = jax.block_until_ready(pixel_norm(x))
    y_ref = pixel_norm_ref(x)
    assert y.shape == (B, N, C)
    assert jnp.allclose(y, y_ref, atol=1e-5, rtol=1e-5), "mismatch (lane-dense case)"

    # Narrow-channel case (C < 128) + row count not a multiple of 8
    # (exercises the full-extent single-block path).
    B2, N2, C2 = 2, 9, 32
    x2 = jax.random.normal(k1, (B2, N2, C2), dtype=jnp.float32)
    y2 = jax.block_until_ready(pixel_norm(x2))
    y2_ref = pixel_norm_ref(x2)
    assert y2.shape == (B2, N2, C2)
    assert jnp.allclose(y2, y2_ref, atol=1e-5, rtol=1e-5), "mismatch (narrow-C case)"

    # Ragged-grid case: R % tm != 0 with multiple tiles (exercises the masked
    # writeback of the partially out-of-bounds last block — the regression
    # check for dropping jnp.pad / out[:R]).
    B3, N3, C3 = 1, 300, 128
    x3 = jax.random.normal(k2, (B3, N3, C3), dtype=jnp.float32)
    y3 = jax.block_until_ready(pixel_norm(x3))
    y3_ref = pixel_norm_ref(x3)
    assert y3.shape == (B3, N3, C3)
    assert jnp.allclose(y3, y3_ref, atol=1e-5, rtol=1e-5), "mismatch (ragged case)"

    print("KERNEL_OK")
</pallas_src>

<mosaic_0001>
module attributes {stable_mosaic.version = 11 : i64} {
  func.func @_pixelnorm_kernel(%arg0: i32, %arg1: memref<32x128xf32, #tpu.memory_space<vmem>>, %arg2: memref<32x128xf32, #tpu.memory_space<vmem>>) attributes {dimension_semantics = [#tpu.dimension_semantics<parallel>], iteration_bounds = array<i64: 4>, scalar_prefetch = 0 : i64, scratch_operands = 0 : i64, tpu.core_type = #tpu.core_type<tc>, window_params = [{transform_indices = @transform_0, window_bounds = array<i64: 32, 128>}, {transform_indices = @transform_1, window_bounds = array<i64: 32, 128>}]} {
    %c0 = arith.constant 0 : index
    %c0_0 = arith.constant 0 : index
    %0 = vector.load %arg1[%c0, %c0_0] : memref<32x128xf32, #tpu.memory_space<vmem>>, vector<32x128xf32>
    %1 = arith.mulf %0, %0 : vector<32x128xf32>
    %cst = arith.constant dense<0.000000e+00> : vector<32xf32>
    %2 = vector.multi_reduction <add>, %1, %cst [1] : vector<32x128xf32> to vector<32xf32>
    %3 = vector.shape_cast %2 : vector<32xf32> to vector<32x1xf32>
    %cst_1 = arith.constant 1.280000e+02 : f32
    %4 = vector.broadcast %cst_1 : f32 to vector<32x1xf32>
    %5 = arith.divf %3, %4 : vector<32x1xf32>
    %cst_2 = arith.constant 9.99999993E-9 : f32
    %6 = vector.broadcast %cst_2 : f32 to vector<32x1xf32>
    %7 = arith.addf %5, %6 : vector<32x1xf32>
    %8 = math.rsqrt %7 : vector<32x1xf32>
    %9 = vector.broadcast %8 : vector<32x1xf32> to vector<32x128xf32>
    %10 = arith.mulf %0, %9 : vector<32x128xf32>
    %c0_3 = arith.constant 0 : index
    %c0_4 = arith.constant 0 : index
    %11 = vector.load %arg2[%c0_3, %c0_4] : memref<32x128xf32, #tpu.memory_space<vmem>>, vector<32x128xf32>
    tpu.vector_store %arg2[%c0_3, %c0_4], %10 {strides = array<i32>} : memref<32x128xf32, #tpu.memory_space<vmem>>, vector<32x128xf32>,
    return
  }
  func.func @transform_0(%arg0: i32) -> (i32, i32) {
    %c0_i32 = arith.constant 0 : i32
    %c0_i32_0 = arith.constant 0 : i32
    return %arg0, %c0_i32 : i32, i32
  }
  func.func @transform_1(%arg0: i32) -> (i32, i32) {
    %c0_i32 = arith.constant 0 : i32
    %c0_i32_0 = arith.constant 0 : i32
    return %arg0, %c0_i32 : i32, i32
  }
}

</mosaic_0001>

<bundles_post_ra>
// kernel: tpu_custom_call.1
= control target key start
LH: loop header
LB: loop body
LE: loop exit
PB: predicated region body
PF: predicated region fallthrough
CT: control target
= control target key end

     0   :  { %6 = vsyncpa [#allocation3], 0  ;;  %s601_s0 = inlined_call_operand.hbm [shape: f32[128,128], index: 0, kind: input, shape index: {}]   ;;  %s602_s1 = inlined_call_operand.hbm [shape: f32[128,128], index: 1, kind: output, shape index: {}]  }
   0x1   :  { %8 = vsyncpa [#allocation3 + $0x1], 0 }
   0x2   :  { %9 = vsyncpa [#allocation4], 0 }
   0x3   :  { %11 = vsyncpa [#allocation4 + $0x1], 0  ;;  %s445_s6 = smov 0   ;;  %s447_s7 = smov 0  }
   0x4   :  { %s449_s8 = smov 0   ;;  %s451_s9 = smov 0  }
   0x5 LB: > { %s466_s10 = sadd.s32 4294967295, %s427_s9   ;;  %s261_s11 = sadd.s32 4294967294, %s427_s9   ;;  %s427_s9 = sphi %s451_s9, %s616_s9   ;;  %s423_s8 = sphi %s449_s8, %s615_s8   ;;  %s419_s7 = sphi %s447_s7, %s614_s7   ;;  %s415_s6 = sphi %s445_s6, %s613_s6  }
   0x6   : > { %s470_s12 = sadd.s32 1, %s427_s9   ;;  %s24_s13 = sadd.s32 1, %s423_s8 }
   0x7   : > { %s21_s14 = ssub.s32 %s427_s9, %s470_s12  ;;  %p31_p0 = scmp.ne.s32.totalorder %s423_s8, %s419_s7 }
   0x8   : > { %p22_p1 = scmp.eq.s32.totalorder %s21_s14, 0  ;;  %p32_p2 = scmp.eq.s32.totalorder %s427_s9, 0 }
   0x9   : > { %p37_p3 = scmp.ne.s32.totalorder %s419_s7, %s415_s6  ;;  %p38_p4 = scmp.eq.s32.totalorder %s466_s10, 0 }
   0xa   : > { %s482_s15 = scalar_select %p22_p1, %s423_s8, %s24_s13  }
   0xb   : > { %p484_p5 = por %p32_p2, %p31_p0  ;;  %p488_p6 = por %p38_p4, %p37_p3 }
   0xc   : > { %p61_p7 = scmp.eq.s32.totalorder %s466_s10, 3  ;;  %p67_p8 = scmp.eq.s32.totalorder %s261_s11, 3 }
   0xd   : > { %s606_s17 = scalar_select %p488_p6, 1, 0 }
   0xe   : > { %p289_p9 = scmp.lt.s32.totalorder %s427_s9, 4  ;;  %p494_p10 = por %p61_p7, %p31_p0 }
   0xf   : > { %p498_p11 = por %p67_p8, %p37_p3  ;;  %s87_s20 = sand.u32 1, %s423_s8  }
  0x10   : > { %s607_s18 = scalar_select %p494_p10, 1, 0 }
  0x11   : > { %s608_s19 = scalar_select %p498_p11, 1, 0 }
  0x12   : > { %s275_s21 = sshll.u32 %s427_s9, 9  ;;  %s264_s22 = sshll.u32 %s87_s20, 5 }
  0x13   : > { %s507_s25 = scalar_lea.hbm %s601_s0, %s275_s21  ;;  %s91_s26 = scalar_lea.vmem [#allocation2], %s264_s22 }
  0x14   : > { %s98_s27 = sshll.u32 %s91_s26, 4  ;;  %p511_p12 = pnand %p289_p9, %p484_p5  ;;  %s515_s27 = int_to_ptr.vmem [resolvable:$true] %s98_s27 }
  0x15   : > { %s517_s29 = scalar_lea.sflag [#allocation3], %s87_s20  ;;  %s335_s30 = scalar_lea.hbm %s507_s25, 512 }
  0x16   : > { %p336_p13 = scmp.ne.s32.totalorder %s507_s25, %s335_s30  ;;  %p337_p0 = pneg %p511_p12 }
  0x17   : > { %s340_s4 = scalar_lea.hbm %s601_s0, 2048  ;;  %p341_p3 = scmp.lt.s32.totalorder %s507_s25, %s601_s0 }
  0x18   : > { %p338_p1 = pnand %p337_p0, %p336_p13  ;;  %p342_p4 = scmp.lt.s32.totalorder %s340_s4, %s335_s30 }
  0x1a   : > { %p339_p2 = pneg %p338_p1  ;;  %p343_p5 = por %p342_p4, %p341_p3 }
  0x1c   : > { %p344_p7 = pnand %p343_p5, %p339_p2 }
  0x1e   : > { %347 = shalt.err (!%p344_p7)
}
  0x1f   : > { %s348_s13 = scalar_lea.vmem %s515_s27, 512  ;;  %s429_s14 = smov [#allocation2]  }
  0x20   : > { %p349_p8 = scmp.ne.s32.totalorder %s515_s27, %s348_s13  ;;  %s353_s16 = sshll.u32 %s429_s14, 4  ;;  %s354_s16 = int_to_ptr.vmem [resolvable:$false] %s353_s16 }
  0x21   : > { %s355_s20 = scalar_lea.vmem %s354_s16, 1024  ;;  %p356_p1 = scmp.lt.s32.totalorder %s515_s27, %s354_s16 }
  0x22   : > { %p351_p9 = pnand %p349_p8, %p337_p0  ;;  %p357_p11 = scmp.lt.s32.totalorder %s355_s20, %s348_s13 }
  0x24   : > { %p352_p13 = pneg %p351_p9  ;;  %p358_p10 = por %p357_p11, %p356_p1 }
  0x26   : > { %p359_p6 = pnand %p358_p10, %p352_p13 }
  0x28   : > { %362 = shalt.err (!%p359_p6)
}
  0x29   : > { %s430_s21 = smov 128   ;;  %s431_s22 = smov 8  }
  0x2a   : > { %284 = dma.hbm_to_vmem [thread:$0]  (!%p511_p12), %s507_s25, 512, %s515_s27, %s517_s29, %s430_s21, %s430_s21, %s431_s22  }
  0x2b   : > { %p267_p0 = scmp.ge.s32.totalorder %s427_s9, 1  ;;  %p106_p2 = scmp.lt.s32.totalorder %s427_s9, 5 }
  0x2d   : > { %p107_p3 = pnand %p267_p0, %p106_p2 }
  0x2e   : > { %s541_s23 = sand.u32 (!%p107_p3), 1, %s419_s7   ;;  %p610_p6 = scmp.ne.s32.totalorder (!%p107_p3), %s606_s17, 0 }
  0x2f   : > { %110 = sbr.rel (%p107_p3) target bundleno = 233 (0xe9), region = 24  ;;  %s268_s24 = sshll.u32 (!%p107_p3), %s541_s23, 5 }
  0x30   : > { %s113_s26 = scalar_lea.sflag (!%p107_p3), [#allocation3], %s541_s23  ;;  %s116_s30 = scalar_lea.vmem (!%p107_p3), [#allocation2], %s268_s24 }
  0x34   : > { %406 = dma.done.wait (%p610_p6), %s113_s26, 512  }
  0x35   : > { %408 = vsyncadd (%p610_p6), %s113_s26, 4294966784  ;;  %v139_v0 = vld [vmem:[%s116_s30 + $0x10] sm:$0xff]  ;;  %v137_v1 = vld [vmem:[%s116_s30] sm:$0xff]  ;;  %s276_s17 = sshll.u32 %s466_s10, 9  ;;  %s134_s25 = scalar_lea.vmem [#allocation5], %s268_s24 }
  0x36   : > { %v140_v2 = vld [vmem:[%s116_s30 + $0x18] sm:$0xff]  ;;  %v143_v3 = vmul.f32 %v139_v0, %v139_v0  ;;  %v141_v4 = vmul.f32 %v137_v1, %v137_v1  ;;  %v138_v5 = vld [vmem:[%s116_s30 + $0x8] sm:$0xff]  ;;  %s188_s27 = sshll.u32 %s134_s25, 4  ;;  %s557_s2 = scalar_lea.hbm %s602_s1, %s276_s17  ;;  %s559_s27 = int_to_ptr.vmem [resolvable:$true] %s188_s27 }
  0x37   : > { %v144_v6 = vmul.f32 %v140_v2, %v140_v2  ;;  %v142_v7 = vmul.f32 %v138_v5, %v138_v5  ;;  %s175_s10 = scalar_lea.sflag [#allocation4], %s541_s23  ;;  %s363_s3 = scalar_lea.vmem %s559_s27, 512 }
  0x38   : > { %149 = vadd.xlane.f32.xlu1 %v143_v3  ;;  %145 = vadd.xlane.f32.xlu0 %v141_v4  ;;  %p364_p10 = scmp.ne.s32.totalorder %s559_s27, %s363_s3  ;;  %p611_p11 = scmp.ne.s32.totalorder %s607_s18, 0 }
  0x39   : > { %s432_s4 = smov [#allocation5]  }
  0x3a   : > { %p365_p12 = pnand %p364_p10, %p611_p11  ;;  %s367_s5 = sshll.u32 %s432_s4, 4  ;;  %s368_s5 = int_to_ptr.vmem [resolvable:$false] %s367_s5 }
  0x3b   : > { %s369_s11 = scalar_lea.vmem %s368_s5, 1024  ;;  %p370_p5 = scmp.lt.s32.totalorder %s559_s27, %s368_s5 }
  0x3c   : > { %151 = vadd.xlane.f32.xlu1 %v144_v6  ;;  %147 = vadd.xlane.f32.xlu0 %v142_v7  ;;  %p366_p4 = pneg %p365_p12  ;;  %p371_p7 = scmp.lt.s32.totalorder %s369_s11, %s363_s3 }
  0x3e   : > { %p372_p8 = por %p371_p7, %p370_p5 }
  0x40   : > { %p373_p9 = pnand %p372_p8, %p366_p4 }
  0xc1   : > { %v150_v8 = vpop.xlane.xlu1 %149  ;;  %v146_v9 = vpop.xlane.xlu0 %145 }
  0xc2   : > { %v156_v10 = vmul.f32 0.0078125, %v150_v8  ;;  %v154_v11 = vmul.f32 0.0078125, %v146_v9 }
  0xc4   : > { %v160_v12 = vadd.f32 1e-08, %v156_v10  ;;  %v158_v13 = vadd.f32 1e-08, %v154_v11 }
  0xc5   : > { %v152_v14 = vpop.xlane.xlu1 %151  ;;  %v148_v15 = vpop.xlane.xlu0 %147 }
  0xc6   : > { %327 = vrsqrt.f32 %v160_v12  ;;  %v157_v16 = vmul.f32 0.0078125, %v152_v14  ;;  %v155_v17 = vmul.f32 0.0078125, %v148_v15 }
  0xc7   : > { %329 = vrsqrt.f32 %v158_v13 }
  0xc8   : > { %v161_v18 = vadd.f32 1e-08, %v157_v16  ;;  %v159_v19 = vadd.f32 1e-08, %v155_v17 }
  0xca   : > { %331 = vrsqrt.f32 %v161_v18 }
  0xcb   : > { %333 = vrsqrt.f32 %v159_v19 }
  0xd3   : > { %v328_v20 = vpop.eup %327 }
  0xd4   : > { %v330_v21 = vpop.eup %329  ;;  %v168_v22 = vmul.f32 %v328_v20, %v139_v0 }
  0xd5   : > { %v166_v23 = vmul.f32 %v330_v21, %v137_v1 }
  0xd6   : > { %172 = vst [vmem:[%s134_s25 + $0x10] sm:$0xff] %v168_v22 }
  0xd7   : > { %v332_v24 = vpop.eup %331  ;;  %170 = vst [vmem:[%s134_s25] sm:$0xff] %v166_v23 }
  0xd8   : > { %v334_v25 = vpop.eup %333  ;;  %v169_v26 = vmul.f32 %v332_v24, %v140_v2 }
  0xd9   : > { %v167_v27 = vmul.f32 %v334_v25, %v138_v5 }
  0xda   : > { %173 = vst [vmem:[%s134_s25 + $0x18] sm:$0xff] %v169_v26 }
  0xdb   : > { %171 = vst [vmem:[%s134_s25 + $0x8] sm:$0xff] %v167_v27 }
  0xdc   : > { %376 = shalt.err (!%p373_p9)
}
  0xdd   : > { %s377_s13 = scalar_lea.hbm %s557_s2, 512  ;;  %s381_s20 = scalar_lea.hbm %s602_s1, 2048 }
  0xde   : > { %p378_p13 = scmp.ne.s32.totalorder %s557_s2, %s377_s13  ;;  %p382_p2 = scmp.lt.s32.totalorder %s557_s2, %s602_s1 }
  0xdf   : > { %p383_p3 = scmp.lt.s32.totalorder %s381_s20, %s377_s13 }
  0xe0   : > { %p379_p1 = pnand %p378_p13, %p611_p11 }
  0xe1   : > { %p384_p6 = por %p383_p3, %p382_p2 }
  0xe2   : > { %p380_p0 = pneg %p379_p1 }
  0xe4   : > { %p385_p10 = pnand %p384_p6, %p380_p0 }
  0xe6   : > { %388 = shalt.err (!%p385_p10)
}
  0xe7   : > { %s433_s24 = smov 128   ;;  %s434_s26 = smov 8  }
  0xe8   : > { %279 = dma.vmem_to_hbm [thread:$0]  (%p611_p11), %s559_s27, 512, %s557_s2, %s175_s10, %s433_s24, %s433_s24, %s434_s26  }
  0xe9 PF: > { %p290_p12 = scmp.ge.s32.totalorder %s427_s9, 2  ;;  %s203_s30 = sand.u32 1, %s415_s6  }
  0xea   : > { %p612_p4 = scmp.ne.s32.totalorder %s608_s19, 0  ;;  %s204_s17 = scalar_lea.sflag [#allocation4], %s203_s30 }
  0xec   : > { %p286_p5 = pnand %p290_p12, %p612_p4 }
  0xee   : > { %p287_p7 = pneg %p286_p5 }
  0xf0   : > { %410 = dma.done.wait (%p287_p7), %s204_s17, 512  }
  0xf1   : > { %412 = vsyncadd (%p287_p7), %s204_s17, 4294966784  ;;  %p14_p8 = scmp.ge.s32.totalorder %s470_s12, 6   ;;  %s613_s6 = smov %s419_s7 }
  0xf2   : > { %s614_s7 = smov %s423_s8  ;;  %s615_s8 = smov %s482_s15 }
  0xf3   : > { %s616_s9 = smov %s470_s12  ;;  %16 = sbr.rel (!%p14_p8) target bundleno = 5 (0x5), region = 69 }
  0xf8   :  { %209 = vsyncpa [#allocation3], 1 }
  0xf9   :  { %211 = vsyncpa [#allocation3 + $0x1], 1 }
  0xfa   :  { %212 = vsyncpa [#allocation4], 1 }
  0xfb   :  { %214 = vsyncpa [#allocation4 + $0x1], 1 }

</bundles_post_ra>
